<compile_context>
chip_gen: v6e
topology: v6e:2x2x1
jax: 0.10.0
libtpu: 0.0.40
codegen_flags: <defaults>
</compile_context>

<pallas_src>
import jax
import jax.numpy as jnp
from jax.experimental import pallas as pl
from jax.experimental.pallas import tpu as pltpu

_LANES = 128           # lane (minor) dimension of every tile
_MAX_TILE_ROWS = 2048  # 2048 x 128 x 4B = 1 MiB per f32 input tile


def _masked_mse_kernel(pred_ref, target_ref, mask_ref, sq_ref, cnt_ref):
    # Upcast on load: inputs stay in their native dtype in HBM/VMEM.
    p = pred_ref[...].astype(jnp.float32)
    t = target_ref[...].astype(jnp.float32)
    m = mask_ref[...].astype(jnp.float32)

    # Fused masking: (pred - target) * mask  (one fewer vmul per element than
    # pred*mask - target*mask; same value up to last-ulp rounding).
    d = (p - t) * m

    # Reduce this (TILE_ROWS, 128) tile to per-lane partial sums (sublane
    # reduce; mostly VPU vreg adds) and park them in row 0 of this tile's
    # (1, 8, 128) lane-dense output block.  The cross-lane reduce happens
    # once, outside the kernel.
    sq_ref[...] = jnp.zeros_like(sq_ref)
    cnt_ref[...] = jnp.zeros_like(cnt_ref)
    sq_ref[0:1, 0:1, :] = jnp.sum(d * d, axis=0, keepdims=True).reshape(1, 1, _LANES)
    cnt_ref[0:1, 0:1, :] = jnp.sum(m, axis=0, keepdims=True).reshape(1, 1, _LANES)


def _round_up(x, m):
    return (x + m - 1) // m * m


def masked_mse_loss(pred, target, mask):
    """Pallas implementation of MaskedMSELoss.forward.

    pred/target/mask: matching shapes (e.g. (batch, seq)), any float/int/bool
    dtypes; mask is 1 for real values, 0 for padding.  Returns float32 scalar.
    """
    assert pred.shape == target.shape == mask.shape

    n = pred.size
    rows = _round_up(pl.cdiv(n, _LANES), 8)
    tile_rows = min(_MAX_TILE_ROWS, rows)
    rows = _round_up(rows, tile_rows)
    num_tiles = rows // tile_rows
    padded_n = rows * _LANES

    def _prep(x):
        x = x.reshape(-1)
        if padded_n != n:
            # zero-pad: padded mask entries are 0, so they contribute nothing
            x = jnp.pad(x, (0, padded_n - n))
        return x.reshape(rows, _LANES)

    p2, t2, m2 = _prep(pred), _prep(target), _prep(mask)

    in_spec = pl.BlockSpec((tile_rows, _LANES), lambda i: (i, 0))
    out_spec = pl.BlockSpec((1, 8, _LANES), lambda i: (i, 0, 0))
    out_shape = jax.ShapeDtypeStruct((num_tiles, 8, _LANES), jnp.float32)

    cost = pl.CostEstimate(
        flops=4 * padded_n,
        transcendentals=0,
        bytes_accessed=int(p2.nbytes + t2.nbytes + m2.nbytes
                           + 2 * num_tiles * 8 * _LANES * 4),
    )

    partial_sq, partial_cnt = pl.pallas_call(
        _masked_mse_kernel,
        grid=(num_tiles,),
        in_specs=[in_spec, in_spec, in_spec],
        out_specs=(out_spec, out_spec),
        out_shape=(out_shape, out_shape),
        compiler_params=pltpu.CompilerParams(
            dimension_semantics=("parallel",)),
        cost_estimate=cost,
    )(p2, t2, m2)

    # Tiny final reduce + divide in plain JAX (keeps the grid axis fully
    # parallel instead of serializing on a scalar accumulator).
    sq_sum = jnp.sum(partial_sq)
    num_valid = jnp.sum(partial_cnt)
    denom = jnp.where(num_valid > 0, num_valid, jnp.float32(1.0))
    return jnp.where(num_valid > 0, sq_sum / denom, sq_sum)


if __name__ == "__main__":
    key = jax.random.PRNGKey(0)
    k1, k2, k3 = jax.random.split(key, 3)

    batch, seq = 2, 8
    pred = jax.random.normal(k1, (batch, seq), dtype=jnp.float32)
    target = jax.random.normal(k2, (batch, seq), dtype=jnp.float32)
    # mask: 1 for real values, 0 for padding
    mask = (jax.random.uniform(k3, (batch, seq)) > 0.3).astype(jnp.float32)

    loss = masked_mse_loss(pred, target, mask)
    jax.block_until_ready(loss)

    # Reference check in plain JAX (original PyTorch op order).
    mp, mt = pred * mask, target * mask
    sq = ((mp - mt) ** 2).sum()
    nv = mask.sum()
    ref = jnp.where(nv > 0, sq / nv, sq)
    assert jnp.allclose(loss, ref, rtol=1e-5, atol=1e-6), (loss, ref)

    print("KERNEL_OK")
</pallas_src>

<mosaic_0001>
module attributes {stable_mosaic.version = 11 : i64} {
  func.func @_masked_mse_kernel(%arg0: i32, %arg1: memref<8x128xf32, #tpu.memory_space<vmem>>, %arg2: memref<8x128xf32, #tpu.memory_space<vmem>>, %arg3: memref<8x128xf32, #tpu.memory_space<vmem>>, %arg4: memref<1x8x128xf32, #tpu.memory_space<vmem>>, %arg5: memref<1x8x128xf32, #tpu.memory_space<vmem>>) attributes {dimension_semantics = [#tpu.dimension_semantics<parallel>], iteration_bounds = array<i64: 1>, scalar_prefetch = 0 : i64, scratch_operands = 0 : i64, tpu.core_type = #tpu.core_type<tc>, window_params = [{transform_indices = @transform_0, window_bounds = array<i64: 8, 128>}, {transform_indices = @transform_1, window_bounds = array<i64: 8, 128>}, {transform_indices = @transform_2, window_bounds = array<i64: 8, 128>}, {transform_indices = @transform_3, window_bounds = array<i64: 1, 8, 128>}, {transform_indices = @transform_4, window_bounds = array<i64: 1, 8, 128>}]} {
    %c0 = arith.constant 0 : index
    %c0_0 = arith.constant 0 : index
    %0 = vector.load %arg1[%c0, %c0_0] : memref<8x128xf32, #tpu.memory_space<vmem>>, vector<8x128xf32>
    %c0_1 = arith.constant 0 : index
    %c0_2 = arith.constant 0 : index
    %1 = vector.load %arg2[%c0_1, %c0_2] : memref<8x128xf32, #tpu.memory_space<vmem>>, vector<8x128xf32>
    %c0_3 = arith.constant 0 : index
    %c0_4 = arith.constant 0 : index
    %2 = vector.load %arg3[%c0_3, %c0_4] : memref<8x128xf32, #tpu.memory_space<vmem>>, vector<8x128xf32>
    %3 = arith.subf %0, %1 : vector<8x128xf32>
    %4 = arith.mulf %3, %2 : vector<8x128xf32>
    %cst = arith.constant 0.000000e+00 : f32
    %5 = vector.broadcast %cst : f32 to vector<1x8x128xf32>
    %c0_5 = arith.constant 0 : index
    %c0_6 = arith.constant 0 : index
    %c0_7 = arith.constant 0 : index
    %6 = vector.load %arg4[%c0_5, %c0_6, %c0_7] : memref<1x8x128xf32, #tpu.memory_space<vmem>>, vector<1x8x128xf32>
    tpu.vector_store %arg4[%c0_5, %c0_6, %c0_7], %5 {strides = array<i32>} : memref<1x8x128xf32, #tpu.memory_space<vmem>>, vector<1x8x128xf32>,
    %cst_8 = arith.constant 0.000000e+00 : f32
    %7 = vector.broadcast %cst_8 : f32 to vector<1x8x128xf32>
    %c0_9 = arith.constant 0 : index
    %c0_10 = arith.constant 0 : index
    %c0_11 = arith.constant 0 : index
    %8 = vector.load %arg5[%c0_9, %c0_10, %c0_11] : memref<1x8x128xf32, #tpu.memory_space<vmem>>, vector<1x8x128xf32>
    tpu.vector_store %arg5[%c0_9, %c0_10, %c0_11], %7 {strides = array<i32>} : memref<1x8x128xf32, #tpu.memory_space<vmem>>, vector<1x8x128xf32>,
    %9 = arith.mulf %4, %4 : vector<8x128xf32>
    %cst_12 = arith.constant dense<0.000000e+00> : vector<128xf32>
    %10 = vector.multi_reduction <add>, %9, %cst_12 [0] : vector<8x128xf32> to vector<128xf32>
    %11 = vector.shape_cast %10 : vector<128xf32> to vector<1x128xf32>
    %12 = vector.shape_cast %11 : vector<1x128xf32> to vector<1x1x128xf32>
    %c0_13 = arith.constant 0 : index
    %c0_14 = arith.constant 0 : index
    %c0_15 = arith.constant 0 : index
    %13 = vector.load %arg4[%c0_13, %c0_14, %c0_15] : memref<1x8x128xf32, #tpu.memory_space<vmem>>, vector<1x1x128xf32>
    tpu.vector_store %arg4[%c0_13, %c0_14, %c0_15], %12 {strides = array<i32>} : memref<1x8x128xf32, #tpu.memory_space<vmem>>, vector<1x1x128xf32>,
    %cst_16 = arith.constant dense<0.000000e+00> : vector<128xf32>
    %14 = vector.multi_reduction <add>, %2, %cst_16 [0] : vector<8x128xf32> to vector<128xf32>
    %15 = vector.shape_cast %14 : vector<128xf32> to vector<1x128xf32>
    %16 = vector.shape_cast %15 : vector<1x128xf32> to vector<1x1x128xf32>
    %c0_17 = arith.constant 0 : index
    %c0_18 = arith.constant 0 : index
    %c0_19 = arith.constant 0 : index
    %17 = vector.load %arg5[%c0_17, %c0_18, %c0_19] : memref<1x8x128xf32, #tpu.memory_space<vmem>>, vector<1x1x128xf32>
    tpu.vector_store %arg5[%c0_17, %c0_18, %c0_19], %16 {strides = array<i32>} : memref<1x8x128xf32, #tpu.memory_space<vmem>>, vector<1x1x128xf32>,
    return
  }
  func.func @transform_0(%arg0: i32) -> (i32, i32) {
    %c0_i32 = arith.constant 0 : i32
    %c0_i32_0 = arith.constant 0 : i32
    return %arg0, %c0_i32 : i32, i32
  }
  func.func @transform_1(%arg0: i32) -> (i32, i32) {
    %c0_i32 = arith.constant 0 : i32
    %c0_i32_0 = arith.constant 0 : i32
    return %arg0, %c0_i32 : i32, i32
  }
  func.func @transform_2(%arg0: i32) -> (i32, i32) {
    %c0_i32 = arith.constant 0 : i32
    %c0_i32_0 = arith.constant 0 : i32
    return %arg0, %c0_i32 : i32, i32
  }
  func.func @transform_3(%arg0: i32) -> (i32, i32, i32) {
    %c0_i32 = arith.constant 0 : i32
    %c0_i32_0 = arith.constant 0 : i32
    %c0_i32_1 = arith.constant 0 : i32
    return %arg0, %c0_i32, %c0_i32_0 : i32, i32, i32
  }
  func.func @transform_4(%arg0: i32) -> (i32, i32, i32) {
    %c0_i32 = arith.constant 0 : i32
    %c0_i32_0 = arith.constant 0 : i32
    %c0_i32_1 = arith.constant 0 : i32
    return %arg0, %c0_i32, %c0_i32_0 : i32, i32, i32
  }
}

</mosaic_0001>

<bundles_post_ra>
// kernel: tpu_custom_call.1
= control target key start
LH: loop header
LB: loop body
LE: loop exit
PB: predicated region body
PF: predicated region fallthrough
CT: control target
= control target key end

     0   :  { %10 = vsyncpa [#allocation3], 0  ;;  %s265_s0 = inlined_call_operand.hbm [shape: f32[8,128], index: 0, kind: input, shape index: {}]   ;;  %s266_s1 = inlined_call_operand.hbm [shape: f32[8,128], index: 1, kind: input, shape index: {}]   ;;  %s267_s2 = inlined_call_operand.hbm [shape: f32[8,128], index: 2, kind: input, shape index: {}]   ;;  %s268_s3 = inlined_call_operand.hbm [shape: f32[1,8,128], index: 3, kind: output, shape index: {0}]   ;;  %s269_s4 = inlined_call_operand.hbm [shape: f32[1,8,128], index: 4, kind: output, shape index: {1}]  }
   0x1   :  { %11 = vsyncpa [#allocation6], 0 }
   0x2   :  { %12 = vsyncpa [#allocation4], 0 }
   0x3   :  { %13 = vsyncpa [#allocation10], 0  ;;  %s219_s15 = smov [#allocation5]   ;;  %s220_s17 = smov [#allocation2]  }
   0x4   :  { %s30_s16 = sshll.u32 %s219_s15, 4  ;;  %s20_s18 = sshll.u32 %s220_s17, 4  ;;  %s31_s16 = int_to_ptr.vmem [resolvable:$true] %s30_s16  ;;  %s21_s18 = int_to_ptr.vmem [resolvable:$true] %s20_s18 }
   0x5   :  { %s119_s19 = scalar_lea.vmem %s31_s16, 128  ;;  %p124_p1 = scmp.lt.s32.totalorder %s31_s16, %s31_s16 }
   0x6   :  { %p120_p0 = scmp.ne.s32.totalorder %s31_s16, %s119_s19  ;;  %p125_p2 = scmp.lt.s32.totalorder %s119_s19, %s119_s19 }
   0x8   :  { %p126_p3 = por %p125_p2, %p124_p1 }
   0xa   :  { %p127_p4 = pnand %p126_p3, %p120_p0 }
   0xc   :  { %130 = shalt.err (!%p127_p4)
}
   0xd   :  { %33 = dma.hbm_to_vmem [thread:$0]  %s266_s1, 128, %s31_s16, [#allocation6]  }
   0xe   :  { %s139_s22 = scalar_lea.vmem %s21_s18, 128  ;;  %p144_p6 = scmp.lt.s32.totalorder %s21_s18, %s21_s18 }
   0xf   :  { %p140_p5 = scmp.ne.s32.totalorder %s21_s18, %s139_s22  ;;  %p145_p7 = scmp.lt.s32.totalorder %s139_s22, %s139_s22 }
  0x11   :  { %p146_p8 = por %p145_p7, %p144_p6 }
  0x13   :  { %p147_p9 = pnand %p146_p8, %p140_p5 }
  0x15   :  { %150 = shalt.err (!%p147_p9)
}
  0x16   :  { %23 = dma.hbm_to_vmem [thread:$0]  %s265_s0, 128, %s21_s18, [#allocation3]  }
  0x17   :  { %s221_s25 = smov [#allocation7]  }
  0x18   :  { %s40_s26 = sshll.u32 %s221_s25, 4  ;;  %s41_s26 = int_to_ptr.vmem [resolvable:$true] %s40_s26 }
  0x19   :  { %s159_s27 = scalar_lea.vmem %s41_s26, 128  ;;  %p164_p11 = scmp.lt.s32.totalorder %s41_s26, %s41_s26 }
  0x1a   :  { %p160_p10 = scmp.ne.s32.totalorder %s41_s26, %s159_s27  ;;  %p165_p12 = scmp.lt.s32.totalorder %s159_s27, %s159_s27 }
  0x1c   :  { %p166_p13 = por %p165_p12, %p164_p11 }
  0x1e   :  { %p167_p0 = pnand %p166_p13, %p160_p10 }
  0x20   :  { %170 = shalt.err (!%p167_p0)
}
  0x21   :  { %43 = dma.hbm_to_vmem [thread:$0]  %s267_s2, 128, %s41_s26, [#allocation6]  }
  0x22   :  { %211 = dma.done.wait [#allocation3], 128  }
  0x23   :  { %212 = vsyncadd [#allocation3], 4294967168 }
  0x24   :  { %213 = dma.done.wait [#allocation6], 256  }
  0x25   :  { %214 = vsyncadd [#allocation6], 4294967040  ;;  %v222_v0 = vmov 0.0   ;;  %v53_v1 = vld [vmem:[#allocation2] sm:$0xff]  ;;  %v54_v2 = vld [vmem:[#allocation5] sm:$0xff]  ;;  %s223_s0 = smov [#allocation9]  }
  0x26   :  { %58 = vst [vmem:[#allocation8] sm:$0xff] %v222_v0  ;;  %59 = vst [vmem:[#allocation9] sm:$0xff] %v222_v0  ;;  %v55_v3 = vld [vmem:[#allocation7] sm:$0xff]  ;;  %v56_v4 = vsub.f32 %v53_v1, %v54_v2  ;;  %s91_s2 = sshll.u32 %s223_s0, 4  ;;  %s224_s29 = smov [#allocation8]   ;;  %s92_s2 = int_to_ptr.vmem [resolvable:$true] %s91_s2 }
  0x27   :  { %v68_v5 = vrot.slane %v55_v3, 4  ;;  %s81_s30 = sshll.u32 %s224_s29, 4  ;;  %s171_s5 = scalar_lea.vmem %s92_s2, 128  ;;  %s82_s30 = int_to_ptr.vmem [resolvable:$true] %s81_s30 }
  0x28   :  { %v57_v6 = vmul.f32 %v56_v4, %v55_v3  ;;  %p172_p1 = scmp.ne.s32.totalorder %s92_s2, %s171_s5  ;;  %p176_p2 = scmp.lt.s32.totalorder %s92_s2, %s92_s2 }
  0x29   :  { %v69_v7 = vadd.f32 %v68_v5, %v55_v3  ;;  %p177_p3 = scmp.lt.s32.totalorder %s171_s5, %s171_s5 }
  0x2a   :  { %v60_v8 = vmul.f32 %v57_v6, %v57_v6 }
  0x2b   :  { %v70_v9 = vrot.slane %v69_v7, 2  ;;  %p178_p4 = por %p177_p3, %p176_p2 }
  0x2c   :  { %v61_v10 = vrot.slane %v60_v8, 4 }
  0x2d   :  { %v71_v11 = vadd.f32 %v70_v9, %v69_v7  ;;  %p179_p5 = pnand %p178_p4, %p172_p1 }
  0x2e   :  { %v62_v12 = vadd.f32 %v61_v10, %v60_v8 }
  0x2f   :  { %v72_v13 = vrot.slane %v71_v11, 1 }
  0x30   :  { %v63_v14 = vrot.slane %v62_v12, 2 }
  0x31   :  { %v73_v15 = vadd.f32 %v72_v13, %v71_v11 }
  0x32   :  { %v64_v16 = vadd.f32 %v63_v14, %v62_v12 }
  0x33   :  { %74 = vst [vmem:[#allocation9] sm:$0x1] %v73_v15 }
  0x34   :  { %182 = shalt.err (!%p179_p5)
}
  0x35   :  { %94 = dma.vmem_to_hbm [thread:$0]  %s92_s2, 128, %s269_s4, [#allocation10]   ;;  %v65_v17 = vrot.slane %v64_v16, 1 }
  0x36   :  { %s191_s8 = scalar_lea.vmem %s82_s30, 128  ;;  %p196_p7 = scmp.lt.s32.totalorder %s82_s30, %s82_s30 }
  0x37   :  { %v66_v18 = vadd.f32 %v65_v17, %v64_v16  ;;  %p192_p6 = scmp.ne.s32.totalorder %s82_s30, %s191_s8  ;;  %p197_p8 = scmp.lt.s32.totalorder %s191_s8, %s191_s8 }
  0x39   :  { %67 = vst [vmem:[#allocation8] sm:$0x1] %v66_v18  ;;  %p198_p9 = por %p197_p8, %p196_p7 }
  0x3b   :  { %p199_p10 = pnand %p198_p9, %p192_p6 }
  0x3d   :  { %202 = shalt.err (!%p199_p10)
}
  0x3e   :  { %84 = dma.vmem_to_hbm [thread:$0]  %s82_s30, 128, %s268_s3, [#allocation4]  }
  0x3f   :  { %215 = dma.done.wait [#allocation4], 128  }
  0x40   :  { %216 = vsyncadd [#allocation4], 4294967168 }
  0x41   :  { %217 = dma.done.wait [#allocation10], 128  }
  0x42   :  { %218 = vsyncadd [#allocation10], 4294967168 }
  0x43   :  { %101 = vsyncpa [#allocation3], 1 }
  0x44   :  { %102 = vsyncpa [#allocation6], 1 }
  0x45   :  { %103 = vsyncpa [#allocation4], 1 }
  0x46   :  { %104 = vsyncpa [#allocation10], 1 }

</bundles_post_ra>
